<compile_context>
chip_gen: v5e
topology: v5e:2x2
jax: 0.10.0
libtpu: 0.0.40
codegen_flags: <defaults>
</compile_context>

<pallas_src>
import numpy as np
import jax
import jax.numpy as jnp
from jax.experimental import pallas as pl
from jax.experimental.pallas import tpu as pltpu


# ---------------------------------------------------------------------------
# glue: bilinear (align_corners=True) interpolation matrices
# ---------------------------------------------------------------------------
def _bilinear_matrix(dst, src):
    """(dst, src) 1-D bilinear interpolation matrix, align_corners=True
    (the PyTorch module calls F.interpolate(..., align_corners=True))."""
    m = np.zeros((dst, src), dtype=np.float32)
    for t in range(dst):
        if dst == 1 or src == 1:
            s = 0.0
        else:
            s = t * (src - 1) / (dst - 1)
        i0 = min(int(np.floor(s)), src - 1)
        i1 = min(i0 + 1, src - 1)
        w1 = s - i0
        m[t, i0] += 1.0 - w1
        m[t, i1] += w1
    return m


# ---------------------------------------------------------------------------
# Pallas kernel: whole prediction head, one batch-block per grid step
# ---------------------------------------------------------------------------
def fedavg_head_kernel(x3_ref, x4_ref, x5_ref,
                       w3_ref, w4_ref, w5_ref,
                       m4t_ref, m5t_ref,
                       par_ref, bp_ref,
                       o_ref):
    f32 = jnp.float32
    bf16 = jnp.bfloat16

    # packed per-channel parameters: 3 BN-folded biases + 3 predict columns.
    b3 = par_ref[0]          # (64, 1) f32, broadcast over lanes
    b4 = par_ref[1]
    b5 = par_ref[2]
    wp0 = par_ref[3]
    wp1 = par_ref[4]
    wp2 = par_ref[5]

    # linear3/4/5: 1x1 conv (+ folded eval-mode BN) + ReLU, channels on
    # sublanes, batch folded into lanes: bf16 (64, C) @ (C, Nb*S) -> f32.
    f3 = jnp.maximum(
        jnp.dot(w3_ref[...], x3_ref[...], preferred_element_type=f32) + b3, 0.0)
    f4 = jnp.maximum(
        jnp.dot(w4_ref[...], x4_ref[...], preferred_element_type=f32) + b4, 0.0)
    f5 = jnp.maximum(
        jnp.dot(w5_ref[...], x5_ref[...], preferred_element_type=f32) + b5, 0.0)

    # bilinear upsample (align_corners=True) to the out3 grid: one matmul
    # against a per-image block-diagonal interpolation matrix; results stay
    # lane-dense at Nb*S3 lanes.
    f4u = jnp.dot(f4.astype(bf16), m4t_ref[...], preferred_element_type=f32)
    f5u = jnp.dot(f5.astype(bf16), m5t_ref[...], preferred_element_type=f32)

    # predict = concat([f5u, f4u*f5u, f3*f4u*f5u], C) . wp + bp,
    # Horner-factored, then one sublane (XLU) reduction -> lane-dense (1, Nb*S3).
    weighted = f5u * (wp0 + f4u * (wp1 + wp2 * f3))
    pred = jnp.sum(weighted, axis=0, keepdims=True) + bp_ref[0]
    o_ref[...] = pred.astype(o_ref.dtype)


# ---------------------------------------------------------------------------
# wrapper
# ---------------------------------------------------------------------------
def fedavg_head(out3, out4, out5, params, batch_block=None):
    """out3/out4/out5 are NCHW backbone features; returns NCHW (N,1,H3,W3)."""
    N, C3, H3, W3 = out3.shape
    _, C4, H4, W4 = out4.shape
    _, C5, H5, W5 = out5.shape
    S3, S4, S5 = H3 * W3, H4 * W4, H5 * W5

    # Whole batch per grid step at demo sizes. For large N pick Nb such that
    # N % Nb == 0 and Nb*S4 / Nb*S5 blocks remain valid (multiples of 128 or
    # full extent); each grid step then handles Nb images.
    Nb = N if batch_block is None else batch_block
    assert N % Nb == 0
    g = N // Nb

    bf16 = jnp.bfloat16

    # NCHW -> (C, N*S), batch folded into the lane axis (n-major, s-minor);
    # matmul operands cast to bf16 (f32 accumulation inside the kernel).
    def fold(x, c, s):
        return jnp.transpose(x, (1, 0, 2, 3)).reshape(c, N * s).astype(bf16)
    x3 = fold(out3, C3, S3)
    x4 = fold(out4, C4, S4)
    x5 = fold(out5, C5, S5)

    # Per-image upsample matrix: transposed kron of 1-D bilinear matrices
    # (matches row-major h*W + w flattening), made block-diagonal over the Nb
    # images folded into lanes.
    def up_mat(hs, ws):
        m = np.kron(_bilinear_matrix(H3, hs), _bilinear_matrix(W3, ws)).T
        return jnp.asarray(np.kron(np.eye(Nb, dtype=np.float32), m)).astype(bf16)
    m4t = up_mat(H4, W4)                      # (Nb*S4, Nb*S3)
    m5t = up_mat(H5, W5)                      # (Nb*S5, Nb*S3)

    w3, b3, w4, b4, w5, b5, wp, bp = params
    w3b, w4b, w5b = (w.astype(bf16) for w in (w3, w4, w5))
    # Pack 3 biases + 3 predict-weight columns into one (6, 64, 1) f32 tensor.
    par = jnp.stack([b3, b4, b5, wp[:, 0], wp[:, 1], wp[:, 2]],
                    axis=0).reshape(6, 64, 1).astype(jnp.float32)

    const2 = lambda r, c: pl.BlockSpec((r, c), lambda i: (0, 0))

    out = pl.pallas_call(
        fedavg_head_kernel,
        out_shape=jax.ShapeDtypeStruct((1, N * S3), jnp.float32),
        grid_spec=pltpu.PrefetchScalarGridSpec(
            num_scalar_prefetch=0,
            grid=(g,),
            in_specs=[
                pl.BlockSpec((C3, Nb * S3), lambda i: (0, i)),
                pl.BlockSpec((C4, Nb * S4), lambda i: (0, i)),
                pl.BlockSpec((C5, Nb * S5), lambda i: (0, i)),
                const2(64, C3), const2(64, C4), const2(64, C5),
                const2(Nb * S4, Nb * S3), const2(Nb * S5, Nb * S3),
                pl.BlockSpec((6, 64, 1), lambda i: (0, 0, 0)),
                pl.BlockSpec(memory_space=pltpu.MemorySpace.SMEM),
            ],
            out_specs=pl.BlockSpec((1, Nb * S3), lambda i: (0, i)),
        ),
        compiler_params=pltpu.CompilerParams(
            # only shard across TensorCores when there are multiple batch
            # blocks worth of work; at g=1 it would just duplicate DMAs.
            dimension_semantics=("parallel",) if g > 1 else ("arbitrary",)),
    )(x3, x4, x5, w3b, w4b, w5b, m4t, m5t, par, bp)

    # (1, N*S3) is n-major, s-minor -> pure reshape back to NCHW (N,1,H3,W3).
    return out.reshape(N, 1, H3, W3)


# ---------------------------------------------------------------------------
# deterministic synthetic parameters (Conv1x1 + eval-mode BN folded)
# ---------------------------------------------------------------------------
def make_params(key):
    keys = jax.random.split(key, 4)

    def conv_bn(k, cin):
        kw, kb = jax.random.split(k)
        w = jax.random.normal(kw, (64, cin), jnp.float32) / np.sqrt(cin)
        bc = jax.random.normal(kb, (64,), jnp.float32) * 0.01
        c = jnp.arange(64, dtype=jnp.float32)
        gamma = 1.0 + 0.01 * c
        beta = 0.02 * c - 0.3
        mean = 0.005 * c
        var = 1.0 + 0.03 * c
        s = gamma / jnp.sqrt(var + 1e-5)            # eval-mode BN fold
        return w * s[:, None], s * (bc - mean) + beta     # (64,cin), (64,)

    w3, b3 = conv_bn(keys[0], 128)
    w4, b4 = conv_bn(keys[1], 320)
    w5, b5 = conv_bn(keys[2], 512)
    # predict 1x1 conv weight, columns = [out5, out4*out5, out3*out4*out5]
    wp = jax.random.normal(keys[3], (64, 3), jnp.float32) * 0.05
    bp = jnp.full((1,), 0.1, jnp.float32)
    return (w3, b3, w4, b4, w5, b5, wp, bp)


# ---------------------------------------------------------------------------
# pure-JAX reference (mirrors the kernel's bf16 matmul-operand quantization,
# but uses the straightforward concat-style predict to validate the Horner
# factoring and the block-diagonal upsample)
# ---------------------------------------------------------------------------
def reference_head(out3, out4, out5, params):
    w3, b3, w4, b4, w5, b5, wp, bp = params
    N, _, H3, W3 = out3.shape
    q = lambda a: a.astype(jnp.bfloat16).astype(jnp.float32)

    def cbr(x, w, b):
        y = jnp.einsum('oc,nchw->nohw', q(w), q(x)) + b.reshape(1, 64, 1, 1)
        return jnp.maximum(y, 0.0)

    f3 = cbr(out3, w3, b3)
    f4 = cbr(out4, w4, b4)
    f5 = cbr(out5, w5, b5)

    def up(f):
        n, c, hs, ws = f.shape
        m = q(jnp.asarray(
            np.kron(_bilinear_matrix(H3, hs), _bilinear_matrix(W3, ws))))
        fr = q(f).reshape(n, c, hs * ws)
        return jnp.einsum('ts,ncs->nct', m, fr).reshape(n, c, H3, W3)

    f5u = up(f5)
    f4u = up(f4)
    p2 = f4u * f5u
    p3 = f3 * p2
    col = lambda k: wp[:, k].reshape(1, 64, 1, 1)
    pred = jnp.sum(f5u * col(0) + p2 * col(1) + p3 * col(2),
                   axis=1, keepdims=True) + bp[0]
    return pred                                      # (N, 1, H3, W3)


if __name__ == "__main__":
    key = jax.random.PRNGKey(0)
    N = 2
    # pvt_v2_b2 branch: channels = [64, 128, 320, 512]; input 64x64 ->
    # out3 stride 8 (8x8, 128ch), out4 stride 16 (4x4, 320ch),
    # out5 stride 32 (2x2, 512ch)
    H3 = W3 = 8
    H4 = W4 = 4
    H5 = W5 = 2
    C3, C4, C5 = 128, 320, 512

    k3, k4, k5, kp = jax.random.split(key, 4)
    out3 = jax.random.normal(k3, (N, C3, H3, W3), jnp.float32)
    out4 = jax.random.normal(k4, (N, C4, H4, W4), jnp.float32)
    out5 = jax.random.normal(k5, (N, C5, H5, W5), jnp.float32)
    params = make_params(kp)

    pred = jax.block_until_ready(fedavg_head(out3, out4, out5, params))
    assert pred.shape == (N, 1, H3, W3), pred.shape

    ref = jax.block_until_ready(reference_head(out3, out4, out5, params))
    np.testing.assert_allclose(np.asarray(pred), np.asarray(ref),
                               rtol=2e-3, atol=2e-3)
    print("KERNEL_OK")
</pallas_src>

<mosaic_0001>
module attributes {stable_mosaic.version = 11 : i64} {
  func.func @fedavg_head_kernel(%arg0: i32, %arg1: memref<128x128xbf16, #tpu.memory_space<vmem>>, %arg2: memref<320x32xbf16, #tpu.memory_space<vmem>>, %arg3: memref<512x8xbf16, #tpu.memory_space<vmem>>, %arg4: memref<64x128xbf16, #tpu.memory_space<vmem>>, %arg5: memref<64x320xbf16, #tpu.memory_space<vmem>>, %arg6: memref<64x512xbf16, #tpu.memory_space<vmem>>, %arg7: memref<32x128xbf16, #tpu.memory_space<vmem>>, %arg8: memref<8x128xbf16, #tpu.memory_space<vmem>>, %arg9: memref<6x64x1xf32, #tpu.memory_space<vmem>>, %arg10: memref<1xf32, #tpu.memory_space<smem>>, %arg11: memref<1x128xf32, #tpu.memory_space<vmem>>) attributes {dimension_semantics = [#tpu.dimension_semantics<arbitrary>], iteration_bounds = array<i64: 1>, scalar_prefetch = 0 : i64, scratch_operands = 0 : i64, tpu.core_type = #tpu.core_type<tc>, window_params = [{transform_indices = @transform_0, window_bounds = array<i64: 128, 128>}, {transform_indices = @transform_1, window_bounds = array<i64: 320, 32>}, {transform_indices = @transform_2, window_bounds = array<i64: 512, 8>}, {pipeline_mode = #tpu.pipeline_mode<synchronous>, transform_indices = @transform_3, window_bounds = array<i64: 64, 128>}, {pipeline_mode = #tpu.pipeline_mode<synchronous>, transform_indices = @transform_4, window_bounds = array<i64: 64, 320>}, {pipeline_mode = #tpu.pipeline_mode<synchronous>, transform_indices = @transform_5, window_bounds = array<i64: 64, 512>}, {pipeline_mode = #tpu.pipeline_mode<synchronous>, transform_indices = @transform_6, window_bounds = array<i64: 32, 128>}, {pipeline_mode = #tpu.pipeline_mode<synchronous>, transform_indices = @transform_7, window_bounds = array<i64: 8, 128>}, {pipeline_mode = #tpu.pipeline_mode<synchronous>, transform_indices = @transform_8, window_bounds = array<i64: 6, 64, 1>}, {transform_indices = @transform_9, window_bounds = array<i64: 1>}, {transform_indices = @transform_10, window_bounds = array<i64: 1, 128>}]} {
    %c0 = arith.constant 0 : index
    %c0_0 = arith.constant 0 : index
    %c0_1 = arith.constant 0 : index
    %0 = vector.load %arg9[%c0, %c0_0, %c0_1] : memref<6x64x1xf32, #tpu.memory_space<vmem>>, vector<1x64x1xf32>
    %1 = vector.shape_cast %0 : vector<1x64x1xf32> to vector<64x1xf32>
    %c1 = arith.constant 1 : index
    %c0_2 = arith.constant 0 : index
    %c0_3 = arith.constant 0 : index
    %2 = vector.load %arg9[%c1, %c0_2, %c0_3] : memref<6x64x1xf32, #tpu.memory_space<vmem>>, vector<1x64x1xf32>
    %3 = vector.shape_cast %2 : vector<1x64x1xf32> to vector<64x1xf32>
    %c2 = arith.constant 2 : index
    %c0_4 = arith.constant 0 : index
    %c0_5 = arith.constant 0 : index
    %4 = vector.load %arg9[%c2, %c0_4, %c0_5] : memref<6x64x1xf32, #tpu.memory_space<vmem>>, vector<1x64x1xf32>
    %5 = vector.shape_cast %4 : vector<1x64x1xf32> to vector<64x1xf32>
    %c3 = arith.constant 3 : index
    %c0_6 = arith.constant 0 : index
    %c0_7 = arith.constant 0 : index
    %6 = vector.load %arg9[%c3, %c0_6, %c0_7] : memref<6x64x1xf32, #tpu.memory_space<vmem>>, vector<1x64x1xf32>
    %7 = vector.shape_cast %6 : vector<1x64x1xf32> to vector<64x1xf32>
    %c4 = arith.constant 4 : index
    %c0_8 = arith.constant 0 : index
    %c0_9 = arith.constant 0 : index
    %8 = vector.load %arg9[%c4, %c0_8, %c0_9] : memref<6x64x1xf32, #tpu.memory_space<vmem>>, vector<1x64x1xf32>
    %9 = vector.shape_cast %8 : vector<1x64x1xf32> to vector<64x1xf32>
    %c5 = arith.constant 5 : index
    %c0_10 = arith.constant 0 : index
    %c0_11 = arith.constant 0 : index
    %10 = vector.load %arg9[%c5, %c0_10, %c0_11] : memref<6x64x1xf32, #tpu.memory_space<vmem>>, vector<1x64x1xf32>
    %11 = vector.shape_cast %10 : vector<1x64x1xf32> to vector<64x1xf32>
    %c0_12 = arith.constant 0 : index
    %c0_13 = arith.constant 0 : index
    %12 = vector.load %arg4[%c0_12, %c0_13] : memref<64x128xbf16, #tpu.memory_space<vmem>>, vector<64x128xbf16>
    %c0_14 = arith.constant 0 : index
    %c0_15 = arith.constant 0 : index
    %13 = vector.load %arg1[%c0_14, %c0_15] : memref<128x128xbf16, #tpu.memory_space<vmem>>, vector<128x128xbf16>
    %cst = arith.constant dense<0.000000e+00> : vector<64x128xf32>
    %14 = tpu.matmul %12, %13, %cst {dimension_numbers = #tpu.dot_dimension_numbers<[1], [0], [0], [1], [0, 0, 1, 1], [], []>} : vector<64x128xbf16>, vector<128x128xbf16>, vector<64x128xf32> -> vector<64x128xf32>
    %15 = vector.broadcast %1 : vector<64x1xf32> to vector<64x128xf32>
    %16 = arith.addf %14, %15 : vector<64x128xf32>
    %cst_16 = arith.constant 0.000000e+00 : f32
    %17 = vector.broadcast %cst_16 : f32 to vector<64x128xf32>
    %18 = arith.maximumf %16, %17 : vector<64x128xf32>
    %c0_17 = arith.constant 0 : index
    %c0_18 = arith.constant 0 : index
    %19 = vector.load %arg5[%c0_17, %c0_18] : memref<64x320xbf16, #tpu.memory_space<vmem>>, vector<64x320xbf16>
    %c0_19 = arith.constant 0 : index
    %c0_20 = arith.constant 0 : index
    %20 = vector.load %arg2[%c0_19, %c0_20] : memref<320x32xbf16, #tpu.memory_space<vmem>>, vector<320x32xbf16>
    %cst_21 = arith.constant dense<0.000000e+00> : vector<64x32xf32>
    %21 = tpu.matmul %19, %20, %cst_21 {dimension_numbers = #tpu.dot_dimension_numbers<[1], [0], [0], [1], [0, 0, 1, 1], [], []>} : vector<64x320xbf16>, vector<320x32xbf16>, vector<64x32xf32> -> vector<64x32xf32>
    %22 = vector.broadcast %3 : vector<64x1xf32> to vector<64x32xf32>
    %23 = arith.addf %21, %22 : vector<64x32xf32>
    %cst_22 = arith.constant 0.000000e+00 : f32
    %24 = vector.broadcast %cst_22 : f32 to vector<64x32xf32>
    %25 = arith.maximumf %23, %24 : vector<64x32xf32>
    %c0_23 = arith.constant 0 : index
    %c0_24 = arith.constant 0 : index
    %26 = vector.load %arg6[%c0_23, %c0_24] : memref<64x512xbf16, #tpu.memory_space<vmem>>, vector<64x512xbf16>
    %c0_25 = arith.constant 0 : index
    %c0_26 = arith.constant 0 : index
    %27 = vector.load %arg3[%c0_25, %c0_26] : memref<512x8xbf16, #tpu.memory_space<vmem>>, vector<512x8xbf16>
    %cst_27 = arith.constant dense<0.000000e+00> : vector<64x8xf32>
    %28 = tpu.matmul %26, %27, %cst_27 {dimension_numbers = #tpu.dot_dimension_numbers<[1], [0], [0], [1], [0, 0, 1, 1], [], []>} : vector<64x512xbf16>, vector<512x8xbf16>, vector<64x8xf32> -> vector<64x8xf32>
    %29 = vector.broadcast %5 : vector<64x1xf32> to vector<64x8xf32>
    %30 = arith.addf %28, %29 : vector<64x8xf32>
    %cst_28 = arith.constant 0.000000e+00 : f32
    %31 = vector.broadcast %cst_28 : f32 to vector<64x8xf32>
    %32 = arith.maximumf %30, %31 : vector<64x8xf32>
    %33 = arith.truncf %25 : vector<64x32xf32> to vector<64x32xbf16>
    %c0_29 = arith.constant 0 : index
    %c0_30 = arith.constant 0 : index
    %34 = vector.load %arg7[%c0_29, %c0_30] : memref<32x128xbf16, #tpu.memory_space<vmem>>, vector<32x128xbf16>
    %cst_31 = arith.constant dense<0.000000e+00> : vector<64x128xf32>
    %35 = tpu.matmul %33, %34, %cst_31 {dimension_numbers = #tpu.dot_dimension_numbers<[1], [0], [0], [1], [0, 0, 1, 1], [], []>} : vector<64x32xbf16>, vector<32x128xbf16>, vector<64x128xf32> -> vector<64x128xf32>
    %36 = arith.truncf %32 : vector<64x8xf32> to vector<64x8xbf16>
    %c0_32 = arith.constant 0 : index
    %c0_33 = arith.constant 0 : index
    %37 = vector.load %arg8[%c0_32, %c0_33] : memref<8x128xbf16, #tpu.memory_space<vmem>>, vector<8x128xbf16>
    %cst_34 = arith.constant dense<0.000000e+00> : vector<64x128xf32>
    %38 = tpu.matmul %36, %37, %cst_34 {dimension_numbers = #tpu.dot_dimension_numbers<[1], [0], [0], [1], [0, 0, 1, 1], [], []>} : vector<64x8xbf16>, vector<8x128xbf16>, vector<64x128xf32> -> vector<64x128xf32>
    %39 = vector.broadcast %11 : vector<64x1xf32> to vector<64x128xf32>
    %40 = arith.mulf %39, %18 : vector<64x128xf32>
    %41 = vector.broadcast %9 : vector<64x1xf32> to vector<64x128xf32>
    %42 = arith.addf %41, %40 : vector<64x128xf32>
    %43 = arith.mulf %35, %42 : vector<64x128xf32>
    %44 = vector.broadcast %7 : vector<64x1xf32> to vector<64x128xf32>
    %45 = arith.addf %44, %43 : vector<64x128xf32>
    %46 = arith.mulf %38, %45 : vector<64x128xf32>
    %cst_35 = arith.constant dense<0.000000e+00> : vector<128xf32>
    %47 = vector.multi_reduction <add>, %46, %cst_35 [0] : vector<64x128xf32> to vector<128xf32>
    %48 = vector.shape_cast %47 : vector<128xf32> to vector<1x128xf32>
    %c0_36 = arith.constant 0 : index
    %49 = memref.load %arg10[%c0_36] : memref<1xf32, #tpu.memory_space<smem>>
    %50 = vector.broadcast %49 : f32 to vector<1x128xf32>
    %51 = arith.addf %48, %50 : vector<1x128xf32>
    %c0_37 = arith.constant 0 : index
    %c0_38 = arith.constant 0 : index
    %52 = vector.load %arg11[%c0_37, %c0_38] : memref<1x128xf32, #tpu.memory_space<vmem>>, vector<1x128xf32>
    tpu.vector_store %arg11[%c0_37, %c0_38], %51 {strides = array<i32>} : memref<1x128xf32, #tpu.memory_space<vmem>>, vector<1x128xf32>,
    return
  }
  func.func @transform_0(%arg0: i32) -> (i32, i32) {
    %c0_i32 = arith.constant 0 : i32
    %c0_i32_0 = arith.constant 0 : i32
    return %c0_i32, %arg0 : i32, i32
  }
  func.func @transform_1(%arg0: i32) -> (i32, i32) {
    %c0_i32 = arith.constant 0 : i32
    %c0_i32_0 = arith.constant 0 : i32
    return %c0_i32, %arg0 : i32, i32
  }
  func.func @transform_2(%arg0: i32) -> (i32, i32) {
    %c0_i32 = arith.constant 0 : i32
    %c0_i32_0 = arith.constant 0 : i32
    return %c0_i32, %arg0 : i32, i32
  }
  func.func @transform_3(%arg0: i32) -> (i32, i32) {
    %c0_i32 = arith.constant 0 : i32
    %c0_i32_0 = arith.constant 0 : i32
    %c0_i32_1 = arith.constant 0 : i32
    return %c0_i32, %c0_i32_0 : i32, i32
  }
  func.func @transform_4(%arg0: i32) -> (i32, i32) {
    %c0_i32 = arith.constant 0 : i32
    %c0_i32_0 = arith.constant 0 : i32
    %c0_i32_1 = arith.constant 0 : i32
    return %c0_i32, %c0_i32_0 : i32, i32
  }
  func.func @transform_5(%arg0: i32) -> (i32, i32) {
    %c0_i32 = arith.constant 0 : i32
    %c0_i32_0 = arith.constant 0 : i32
    %c0_i32_1 = arith.constant 0 : i32
    return %c0_i32, %c0_i32_0 : i32, i32
  }
  func.func @transform_6(%arg0: i32) -> (i32, i32) {
    %c0_i32 = arith.constant 0 : i32
    %c0_i32_0 = arith.constant 0 : i32
    %c0_i32_1 = arith.constant 0 : i32
    return %c0_i32, %c0_i32_0 : i32, i32
  }
  func.func @transform_7(%arg0: i32) -> (i32, i32) {
    %c0_i32 = arith.constant 0 : i32
    %c0_i32_0 = arith.constant 0 : i32
    %c0_i32_1 = arith.constant 0 : i32
    return %c0_i32, %c0_i32_0 : i32, i32
  }
  func.func @transform_8(%arg0: i32) -> (i32, i32, i32) {
    %c0_i32 = arith.constant 0 : i32
    %c0_i32_0 = arith.constant 0 : i32
    %c0_i32_1 = arith.constant 0 : i32
    %c0_i32_2 = arith.constant 0 : i32
    return %c0_i32, %c0_i32_0, %c0_i32_1 : i32, i32, i32
  }
  func.func @transform_9(%arg0: i32) -> i32 {
    %c0_i32 = arith.constant 0 : i32
    %c0_i32_0 = arith.constant 0 : i32
    return %c0_i32 : i32
  }
  func.func @transform_10(%arg0: i32) -> (i32, i32) {
    %c0_i32 = arith.constant 0 : i32
    %c0_i32_0 = arith.constant 0 : i32
    return %c0_i32, %arg0 : i32, i32
  }
}

</mosaic_0001>

<bundles_post_ra>
// kernel: tpu_custom_call.1
= control target key start
LH: loop header
LB: loop body
LE: loop exit
PB: predicated region body
PF: predicated region fallthrough
CT: control target
= control target key end

     0   :  { %v2035_v3 = vmov 0   ;;  %vm540_vm0 = vcmask 523264   ;;  %s2699_s0 = inlined_call_operand.vmem [shape: bf16[128,128], index: 0, kind: input, shape index: {}]   ;;  %s2700_s1 = inlined_call_operand.vmem [shape: bf16[320,32], index: 1, kind: input, shape index: {}]   ;;  %s2701_s2 = inlined_call_operand.vmem [shape: bf16[512,8], index: 2, kind: input, shape index: {}]   ;;  %s2702_s3 = inlined_call_operand.vmem [shape: bf16[64,128], index: 3, kind: input, shape index: {}]   ;;  %s2703_s4 = inlined_call_operand.vmem [shape: bf16[64,320], index: 4, kind: input, shape index: {}]   ;;  %s2704_s5 = inlined_call_operand.vmem [shape: bf16[64,512], index: 5, kind: input, shape index: {}]   ;;  %s2705_s6 = inlined_call_operand.vmem [shape: bf16[32,128], index: 6, kind: input, shape index: {}]   ;;  %s2706_s7 = inlined_call_operand.vmem [shape: bf16[8,128], index: 7, kind: input, shape index: {}]   ;;  %s2707_s8 = inlined_call_operand.vmem [shape: f32[6,64,1], index: 8, kind: input, shape index: {}]   ;;  %s2708_s9 = inlined_call_operand.<no memory space> [shape: f32[1], index: 9, kind: input, shape index: {}]   ;;  %s2709_s10 = inlined_call_operand.hbm [shape: f32[1,128], index: 10, kind: output, shape index: {}]  }
   0x1   :  { %v42_v0 = vld [vmem:[%s2707_s8 + $0x20] sm:$0xff]  ;;  %v40_v1 = vld [vmem:[%s2707_s8 + $0x10] sm:$0xff]  ;;  %2008 = vset.pattern.permute.xlu2 %v2035_v3  ;;  %2007 = vset.pattern.permute.xlu1 %v2035_v3  ;;  %v1909_v4 = vld [vmem:[%s2699_s0 + $0x38] sm:$0xff] }
   0x2   :  { %v38_v2 = vld [vmem:[%s2707_s8] sm:$0xff]  ;;  %v1937_v5 = vld [vmem:[%s2700_s1 + $0x78] sm:$0xff]  ;;  %2006 = vset.pattern.permute.xlu0 %v2035_v3  ;;  %137 = vperm.xlu2 %2008, %v42_v0   ;;  %v1908_v6 = vld [vmem:[%s2699_s0 + $0x30] sm:$0xff] }
   0x3   :  { %127 = vperm.xlu1 %2007, %v40_v1   ;;  %117 = vperm.xlu0 %2006, %v38_v2   ;;  %v1936_v7 = vld [vmem:[%s2700_s1 + $0x70] sm:$0xff]  ;;  %v2116_v8 = vld [vmem:[%s2700_s1 + $0x98] sm:$0xff]  ;;  %v1470_v10 = vld [vmem:[%s2707_s8 + $0x40] sm:$0xff] }
   0x4   :  { %1992 = vmatpush.bf16.msra.mxu1 %v1909_v4  ;;  %582 = vmatpush.bf16.msra.mxu2 %v1937_v5  ;;  %v2122_v9 = vld [vmem:[%s2700_s1 + $0x90] sm:$0xff]  ;;  %v41_v11 = vld [vmem:[%s2707_s8 + $0x18] sm:$0xff]  ;;  %v39_v12 = vld [vmem:[%s2707_s8 + $0x8] sm:$0xff] }
   0x5   :  { %227 = vmatpush.bf16.msra.mxu0 %v1909_v4  ;;  %2000 = vmatpush.bf16.msra.mxu3 %v2116_v8  ;;  %v1907_v13 = vld [vmem:[%s2699_s0 + $0x28] sm:$0xff]  ;;  %v1906_v16 = vld [vmem:[%s2699_s0 + $0x20] sm:$0xff]  ;;  %v1592_v19 = vld [vmem:[%s2703_s4 + $0x38] sm:$0xf] }
   0x6   :  { %v1935_v14 = vld [vmem:[%s2700_s1 + $0x68] sm:$0xff]  ;;  %v1934_v17 = vld [vmem:[%s2700_s1 + $0x60] sm:$0xff]  ;;  %v1905_v24 = vld [vmem:[%s2699_s0 + $0x18] sm:$0xff] }
   0x7   :  { %v2143_v15 = vld [vmem:[%s2700_s1 + $0x88] sm:$0xff]  ;;  %v2155_v18 = vld [vmem:[%s2700_s1 + $0x80] sm:$0xff]  ;;  %v1933_v25 = vld [vmem:[%s2700_s1 + $0x58] sm:$0xff] }
   0x8   :  { %1993 = vmatpush.bf16.msra.mxu1 %v1908_v6  ;;  %583 = vmatpush.bf16.msra.mxu2 %v1936_v7  ;;  %v1918_v20 = vld [vmem:[%s2703_s4 + $0x40] sm:$0xf0]  ;;  %v1479_v21 = vld [vmem:[%s2707_s8 + $0x88] sm:$0xff]  ;;  %v1965_v27 = vld [vmem:[%s2701_s2 + $0x38] sm:$0xff] }
   0x9   :  { %228 = vmatpush.bf16.msra.mxu0 %v1908_v6  ;;  %2001 = vmatpush.bf16.msra.mxu3 %v2122_v9  ;;  %v1478_v22 = vld [vmem:[%s2707_s8 + $0x80] sm:$0xff]  ;;  %v1471_v23 = vld [vmem:[%s2707_s8 + $0x48] sm:$0xff]  ;;  %v1593_v26 = vor.u32 %v1918_v20, %v1592_v19  ;;  %v1904_v28 = vld [vmem:[%s2699_s0 + $0x10] sm:$0xff] }
   0xa   :  { %322 = vperm.xlu2 %2008, %v1470_v10   ;;  %v1932_v29 = vld [vmem:[%s2700_s1 + $0x50] sm:$0xff]  ;;  %v1473_v32 = vld [vmem:[%s2707_s8 + $0x58] sm:$0xff] }
   0xb   :  { %132 = vperm.xlu1 %2007, %v41_v11   ;;  %122 = vperm.xlu0 %2006, %v39_v12   ;;  %v1964_v30 = vld [vmem:[%s2701_s2 + $0x30] sm:$0xff] }
   0xc   :  { %1994 = vmatpush.bf16.msra.mxu1 %v1907_v13  ;;  %584 = vmatpush.bf16.msra.mxu2 %v1935_v14  ;;  %v1480_v31 = vld [vmem:[%s2707_s8 + $0x90] sm:$0xff] }
   0xd   :  { %229 = vmatpush.bf16.msra.mxu0 %v1907_v13  ;;  %2002 = vmatpush.bf16.msra.mxu3 %v2143_v15 }
  0x10   :  { %1995 = vmatpush.bf16.msra.mxu1 %v1906_v16  ;;  %585 = vmatpush.bf16.msra.mxu2 %v1934_v17 }
  0x11   :  { %230 = vmatpush.bf16.msra.mxu0 %v1906_v16  ;;  %2003 = vmatpush.bf16.msra.mxu3 %v2155_v18 }
  0x12   :  { %735 = vperm.xlu2 %2008, %v1479_v21  }
  0x13   :  { %730 = vperm.xlu1 %2007, %v1478_v22   ;;  %327 = vperm.xlu0 %2006, %v1471_v23  }
  0x14   :  { %1996 = vmatpush.bf16.msra.mxu1 %v1905_v24  ;;  %586 = vmatpush.bf16.msra.mxu2 %v1933_v25 }
  0x15   :  { %231 = vmatpush.bf16.msra.mxu0 %v1905_v24  ;;  %1688 = vmatmul.msk.bf16.vlgmr.msra.gmra.mxu3 %vm540_vm0, %v1593_v26 }
  0x16   :  { %1040 = vmatpush.bf16.msrb.mxu3 %v1965_v27 }
  0x17   :  { %16 = vsyncpa [#allocation4], 0  ;;  %v1472_v33 = vld [vmem:[%s2707_s8 + $0x50] sm:$0xff]  ;;  %v1903_v34 = vld [vmem:[%s2699_s0 + $0x8] sm:$0xff]  ;;  %vm1244_vm1 = vcmask 1043456   ;;  %vm1184_vm2 = vcmask 261120  }
  0x18   :  { %1997 = vmatpush.bf16.msra.mxu1 %v1904_v28  ;;  %587 = vmatpush.bf16.msra.mxu2 %v1932_v29  ;;  %v1931_v35 = vld [vmem:[%s2700_s1 + $0x48] sm:$0xff]  ;;  %v1902_v37 = vld [vmem:[%s2699_s0] sm:$0xff]  ;;  %v1562_v40 = vld [vmem:[%s2703_s4 + $0xc] sm:$0xf0]  ;;  %vm1231_vm3 = vcmask 64512   ;;  %s2036_s20 = smov [#allocation3]  }
  0x19   :  { %232 = vmatpush.bf16.msra.mxu0 %v1904_v28  ;;  %v1963_v36 = vld [vmem:[%s2701_s2 + $0x28] sm:$0xff]  ;;  %v1930_v38 = vld [vmem:[%s2700_s1 + $0x40] sm:$0xff]  ;;  %v1929_v41 = vld [vmem:[%s2700_s1 + $0x38] sm:$0xff]  ;;  %s1459_s21 = sshll.u32 %s2036_s20, 4  ;;  %s1461_s23 = sshll.u32 %s2709_s10, 4  ;;  %s1460_s21 = int_to_ptr.vmem [resolvable:$true] %s1459_s21  ;;  %s1462_s23 = int_to_ptr.hbm [resolvable:$true] %s1461_s23 }
  0x1a   :  { %740 = vperm.xlu2 %2008, %v1480_v31   ;;  %1041 = vmatpush.bf16.msrb.mxu3 %v1964_v30  ;;  %v1910_v39 = vld [vmem:[%s2703_s4 + $0x4] sm:$0xf]  ;;  %v1900_v42 = vld [vmem:[%s2702_s3 + $0x10] sm:$0xff]  ;;  %v1475_v44 = vld [vmem:[%s2707_s8 + $0x68] sm:$0xff] }
  0x1b   :  { %337 = vperm.xlu1 %2007, %v1473_v32   ;;  %332 = vperm.xlu0 %2006, %v1472_v33   ;;  %v1565_v43 = vor.u32 %v1910_v39, %v1562_v40  ;;  %v1474_v45 = vld [vmem:[%s2707_s8 + $0x60] sm:$0xff]  ;;  %v1604_v46 = vld [vmem:[%s2703_s4 + $0x50] sm:$0xf]  ;;  %v1921_v47 = vld [vmem:[%s2703_s4 + $0x58] sm:$0xf0] }
  0x1c   :  { %1998 = vmatpush.bf16.msra.mxu1 %v1903_v34  ;;  %588 = vmatpush.bf16.msra.mxu2 %v1931_v35  ;;  %v1481_v48 = vld [vmem:[%s2707_s8 + $0x98] sm:$0xff]  ;;  %v1898_v49 = vld [vmem:[%s2702_s3] sm:$0xff]  ;;  %v1928_v52 = vld [vmem:[%s2700_s1 + $0x30] sm:$0xff]  ;;  %v1605_v53 = vor.u32 %v1921_v47, %v1604_v46 }
  0x1d   :  { %233 = vmatpush.bf16.msra.mxu0 %v1903_v34  ;;  %v1962_v50 = vld [vmem:[%s2701_s2 + $0x20] sm:$0xff]  ;;  %v1973_v51 = vld [vmem:[%s2701_s2 + $0x78] sm:$0xff]  ;;  %v1972_v55 = vld [vmem:[%s2701_s2 + $0x70] sm:$0xff] }
  0x1e   :  { %1042 = vmatpush.bf16.msrb.mxu3 %v1963_v36  ;;  %v1961_v54 = vld [vmem:[%s2701_s2 + $0x18] sm:$0xff]  ;;  %v1476_v56 = vld [vmem:[%s2707_s8 + $0x70] sm:$0xff]  ;;  %v1927_v57 = vld [vmem:[%s2700_s1 + $0x28] sm:$0xff] }
  0x1f   :  { %v1483_v58 = vld [vmem:[%s2707_s8 + $0xa8] sm:$0xff]  ;;  %v1482_v59 = vld [vmem:[%s2707_s8 + $0xa0] sm:$0xff]  ;;  %v1960_v60 = vld [vmem:[%s2701_s2 + $0x10] sm:$0xff] }
  0x20   :  { %1999 = vmatpush.bf16.msra.mxu1 %v1902_v37  ;;  %589 = vmatpush.bf16.msra.mxu2 %v1930_v38  ;;  %v1971_v61 = vld [vmem:[%s2701_s2 + $0x68] sm:$0xff]  ;;  %v1926_v62 = vld [vmem:[%s2700_s1 + $0x20] sm:$0xff]  ;;  %v1913_v63 = vld [vmem:[%s2703_s4 + $0x1c] sm:$0xf] }
  0x21   :  { %234 = vmatpush.bf16.msra.mxu0 %v1902_v37  ;;  %v1574_v0 = vld [vmem:[%s2703_s4 + $0x24] sm:$0xf0]  ;;  %v1970_v2 = vld [vmem:[%s2701_s2 + $0x60] sm:$0xff]  ;;  %v1901_v3 = vld [vmem:[%s2702_s3 + $0x18] sm:$0xff] }
  0x22   :  { %347 = vperm.xlu2 %2008, %v1475_v44   ;;  %1043 = vmatpush.bf16.msrb.mxu3 %v1962_v50  ;;  %v1959_v1 = vld [vmem:[%s2701_s2 + $0x8] sm:$0xff]  ;;  %v1577_v4 = vor.u32 %v1913_v63, %v1574_v0  ;;  %v1485_v5 = vld [vmem:[%s2707_s8 + $0xb8] sm:$0xff]  ;;  %v1484_v6 = vld [vmem:[%s2707_s8 + $0xb0] sm:$0xff] }
  0x23   :  { %245 = vmatmul.bf16.vlgmr.msra.gmra.mxu1 %v1900_v42  ;;  %590 = vmatmul.bf16.vlgmr.msra.gmra.mxu2 %v1565_v43  ;;  %v1477_v7 = vld [vmem:[%s2707_s8 + $0x78] sm:$0xff]  ;;  %v1958_v11 = vld [vmem:[%s2701_s2] sm:$0xff]  ;;  %v1944_v13 = vld [vmem:[%s2704_s5 + $0xc] sm:$0xf0] }
  0x24   :  { %615 = vmatpush.bf16.msrb.mxu2 %v2116_v8  ;;  %553 = vmatpush.bf16.msrb.mxu1 %v1929_v41  ;;  %v1925_v8 = vld [vmem:[%s2700_s1 + $0x18] sm:$0xff]  ;;  %v1692_v12 = vld [vmem:[%s2704_s5] sm:$0xf]  ;;  %v1924_v14 = vld [vmem:[%s2700_s1 + $0x10] sm:$0xff] }
  0x25   :  { %342 = vperm.xlu1 %2007, %v1474_v45   ;;  %745 = vperm.xlu0 %2006, %v1481_v48   ;;  %v1969_v10 = vld [vmem:[%s2701_s2 + $0x58] sm:$0xff]  ;;  %v1968_v16 = vld [vmem:[%s2701_s2 + $0x50] sm:$0xff]  ;;  %v43_v19 = vld [vmem:[%s2707_s8 + $0x28] sm:$0xff] }
  0x26   :  { %235 = vmatmul.bf16.vlgmr.msra.gmra.mxu0 %v1898_v49  ;;  %1689 = vmatmul.msk.bf16.gmra.mxu3 %vm540_vm0, %v1605_v53  ;;  %v45_v17 = vld [vmem:[%s2707_s8 + $0x38] sm:$0xff]  ;;  %v1923_v20 = vld [vmem:[%s2700_s1 + $0x8] sm:$0xff]  ;;  %v1916_v22 = vld [vmem:[%s2703_s4 + $0x34] sm:$0xf] }
  0x27   :  { %1069 = vmatpush.bf16.msrb.mxu0 %v1973_v51  ;;  %1044 = vmatpush.bf16.msrb.mxu3 %v1961_v54  ;;  %v1967_v21 = vld [vmem:[%s2701_s2 + $0x48] sm:$0xff]  ;;  %v1586_v23 = vld [vmem:[%s2703_s4 + $0x3c] sm:$0xf0]  ;;  %v1942_v28 = vld [vmem:[%s2704_s5 + $0x4] sm:$0xf] }
  0x28   :  { %554 = vmatpush.bf16.msrb.mxu1 %v1928_v52  ;;  %616 = vmatpush.bf16.msrb.mxu2 %v2122_v9  ;;  %v1899_v9 = vld [vmem:[%s2702_s3 + $0x8] sm:$0xff]  ;;  %v1922_v24 = vld [vmem:[%s2700_s1] sm:$0xff]  ;;  %v1694_v29 = vld [vmem:[%s2704_s5 + $0x10] sm:$0xf0]  ;;  %v1589_v30 = vor.u32 %v1916_v22, %v1586_v23 }
  0x29   :  { %v1560_v25 = vld [vmem:[%s2703_s4] sm:$0xf]  ;;  %v1911_v26 = vld [vmem:[%s2703_s4 + $0x8] sm:$0xf0]  ;;  %v1504_v31 = vld [vmem:[%s2707_s8 + $0x150] sm:$0xff]  ;;  %v1697_v35 = vor.u32 %v1942_v28, %v1694_v29 }
  0x2a   :  { %352 = vperm.xlu2 %2008, %v1476_v56   ;;  %v1966_v27 = vld [vmem:[%s2701_s2 + $0x40] sm:$0xff]  ;;  %v1981_v32 = vld [vmem:[%s2701_s2 + $0xb8] sm:$0xff]  ;;  %v1561_v33 = vor.u32 %v1911_v26, %v1560_v25  ;;  %v1503_v34 = vld [vmem:[%s2707_s8 + $0x148] sm:$0xff] }
  0x2b   :  { %1070 = vmatpush.bf16.msrb.mxu0 %v1972_v55  ;;  %1045 = vmatpush.bf16.msrb.mxu3 %v1960_v60  ;;  %v1502_v36 = vld [vmem:[%s2707_s8 + $0x140] sm:$0xff]  ;;  %v1948_v38 = vld [vmem:[%s2704_s5 + $0x2c] sm:$0xf0]  ;;  %v1989_v40 = vld [vmem:[%s2701_s2 + $0xf8] sm:$0xff] }
  0x2c   :  { %555 = vmatpush.bf16.msrb.mxu1 %v1927_v57  ;;  %617 = vmatpush.bf16.msrb.mxu2 %v2143_v15  ;;  %v1693_v15 = vor.u32 %v1944_v13, %v1692_v12  ;;  %v1708_v37 = vld [vmem:[%s2704_s5 + $0x20] sm:$0xf]  ;;  %v1980_v39 = vld [vmem:[%s2701_s2 + $0xb0] sm:$0xff]  ;;  %v1507_v43 = vld [vmem:[%s2707_s8 + $0x168] sm:$0xff] }
  0x2d   :  { %755 = vperm.xlu1 %2007, %v1483_v58   ;;  %750 = vperm.xlu0 %2006, %v1482_v59   ;;  %v1709_v41 = vor.u32 %v1948_v38, %v1708_v37  ;;  %v1988_v42 = vld [vmem:[%s2701_s2 + $0xf0] sm:$0xff]  ;;  %v1979_v44 = vld [vmem:[%s2701_s2 + $0xa8] sm:$0xff]  ;;  %v1506_v45 = vld [vmem:[%s2707_s8 + $0x160] sm:$0xff] }
  0x2e   :  { %v1505_v46 = vld [vmem:[%s2707_s8 + $0x158] sm:$0xff]  ;;  %v1987_v47 = vld [vmem:[%s2701_s2 + $0xe8] sm:$0xff]  ;;  %v1978_v48 = vld [vmem:[%s2701_s2 + $0xa0] sm:$0xff] }
  0x2f   :  { %1071 = vmatpush.bf16.msrb.mxu0 %v1971_v61  ;;  %1046 = vmatpush.bf16.msrb.mxu3 %v1959_v1  ;;  %v1919_v49 = vld [vmem:[%s2703_s4 + $0x4c] sm:$0xf]  ;;  %v1598_v50 = vld [vmem:[%s2703_s4 + $0x54] sm:$0xf0]  ;;  %v1914_v52 = vld [vmem:[%s2703_s4 + $0x20] sm:$0xf0] }
  0x30   :  { %556 = vmatpush.bf16.msrb.mxu1 %v1926_v62  ;;  %618 = vmatpush.bf16.msrb.mxu2 %v2155_v18  ;;  %v44_v18 = vld [vmem:[%s2707_s8 + $0x30] sm:$0xff]  ;;  %v1572_v51 = vld [vmem:[%s2703_s4 + $0x18] sm:$0xf]  ;;  %v1946_v53 = vld [vmem:[%s2704_s5 + $0x24] sm:$0xf]  ;;  %v1601_v56 = vor.u32 %v1919_v49, %v1598_v50 }
  0x31   :  { %v1710_v54 = vld [vmem:[%s2704_s5 + $0x30] sm:$0xf0]  ;;  %v1986_v55 = vld [vmem:[%s2701_s2 + $0xe0] sm:$0xff]  ;;  %v1977_v58 = vld [vmem:[%s2701_s2 + $0x98] sm:$0xff]  ;;  %v1573_v59 = vor.u32 %v1914_v52, %v1572_v51 }
  0x32   :  { %765 = vperm.xlu2 %2008, %v1485_v5   ;;  %v1494_v57 = vld [vmem:[%s2707_s8 + $0x100] sm:$0xff]  ;;  %v1509_v60 = vld [vmem:[%s2707_s8 + $0x178] sm:$0xff]  ;;  %v1713_v61 = vor.u32 %v1946_v53, %v1710_v54  ;;  %v1508_v62 = vld [vmem:[%s2707_s8 + $0x170] sm:$0xff] }
  0x33   :  { %1072 = vmatpush.bf16.msrb.mxu0 %v1970_v2  ;;  %250 = vmatmul.bf16.gmra.mxu1 %v1901_v3  ;;  %v1724_v63 = vld [vmem:[%s2704_s5 + $0x40] sm:$0xf]  ;;  %v1952_v0 = vld [vmem:[%s2704_s5 + $0x4c] sm:$0xf0]  ;;  %v1985_v2 = vld [vmem:[%s2701_s2 + $0xd8] sm:$0xff] }
  0x34   :  { %595 = vmatmul.bf16.gmra.mxu2 %v1577_v4  ;;  %557 = vmatpush.bf16.msrb.mxu1 %v1925_v8  ;;  %v1976_v1 = vld [vmem:[%s2701_s2 + $0x90] sm:$0xff]  ;;  %v1725_v3 = vor.u32 %v1952_v0, %v1724_v63  ;;  %v1497_v5 = vld [vmem:[%s2707_s8 + $0x118] sm:$0xff]  ;;  %v1495_v8 = vld [vmem:[%s2707_s8 + $0x108] sm:$0xff] }
  0x35   :  { %760 = vperm.xlu1 %2007, %v1484_v6   ;;  %357 = vperm.xlu0 %2006, %v1477_v7   ;;  %v1984_v4 = vld [vmem:[%s2701_s2 + $0xd0] sm:$0xff]  ;;  %v1975_v6 = vld [vmem:[%s2701_s2 + $0x88] sm:$0xff]  ;;  %v1917_v13 = vld [vmem:[%s2703_s4 + $0x38] sm:$0xf0] }
  0x36   :  { %240 = vmatmul.bf16.gmra.mxu0 %v1899_v9  ;;  %1047 = vmatpush.bf16.msrb.mxu3 %v1958_v11  ;;  %v1496_v7 = vld [vmem:[%s2707_s8 + $0x110] sm:$0xff]  ;;  %v1983_v9 = vld [vmem:[%s2701_s2 + $0xc8] sm:$0xff]  ;;  %v1486_v23 = vld [vmem:[%s2707_s8 + $0xc0] sm:$0xff] }
  0x37   :  { %1073 = vmatpush.bf16.msrb.mxu0 %v1969_v10  ;;  %1127 = vmatpush.bf16.msra.mxu2 %v1989_v40  ;;  %v1568_v10 = vld [vmem:[%s2703_s4 + $0x8] sm:$0xf]  ;;  %v1912_v11 = vld [vmem:[%s2703_s4 + $0x10] sm:$0xf0]  ;;  %v1584_v12 = vld [vmem:[%s2703_s4 + $0x30] sm:$0xf] }
  0x38   :  { %558 = vmatpush.bf16.msrb.mxu1 %v1924_v14  ;;  %v1974_v14 = vld [vmem:[%s2701_s2 + $0x80] sm:$0xff]  ;;  %v1956_v25 = vld [vmem:[%s2704_s5 + $0x6c] sm:$0xf0]  ;;  %v1499_v28 = vld [vmem:[%s2707_s8 + $0x128] sm:$0xff] }
  0x39   :  { %1048 = vmatmul.bf16.vlgmr.msrb.gmra.mxu3 %v1693_v15  ;;  %v1950_v15 = vld [vmem:[%s2704_s5 + $0x44] sm:$0xf]  ;;  %v1488_v29 = vld [vmem:[%s2707_s8 + $0xd0] sm:$0xff]  ;;  %v1501_v37 = vld [vmem:[%s2707_s8 + $0x138] sm:$0xff] }
  0x3a   :  { %152 = vperm.xlu2 %2008, %v45_v17   ;;  %v1982_v17 = vld [vmem:[%s2701_s2 + $0xc0] sm:$0xff]  ;;  %v1947_v51 = vld [vmem:[%s2704_s5 + $0x2c] sm:$0xf]  ;;  %v1718_v52 = vld [vmem:[%s2704_s5 + $0x38] sm:$0xf0] }
  0x3b   :  { %1074 = vmatpush.bf16.msrb.mxu0 %v1968_v16  ;;  %1128 = vmatpush.bf16.msra.mxu2 %v1988_v42  ;;  %v1726_v16 = vld [vmem:[%s2704_s5 + $0x50] sm:$0xf0]  ;;  %v1490_v40 = vld [vmem:[%s2707_s8 + $0xe0] sm:$0xff]  ;;  %v1716_v53 = vld [vmem:[%s2704_s5 + $0x28] sm:$0xf] }
  0x3c   :  { %559 = vmatpush.bf16.msrb.mxu1 %v1923_v20  ;;  %v1585_v20 = vor.u32 %v1917_v13, %v1584_v12  ;;  %v1729_v22 = vor.u32 %v1950_v15, %v1726_v16  ;;  %v1492_v42 = vld [vmem:[%s2707_s8 + $0xf0] sm:$0xff]  ;;  %v1949_v54 = vld [vmem:[%s2704_s5 + $0x34] sm:$0xf0]  ;;  %v1750_v12 = vld [vmem:[%s2704_s5 + $0x78] sm:$0xf0] }
  0x3d   :  { %147 = vperm.xlu1 %2007, %v44_v18   ;;  %142 = vperm.xlu0 %2006, %v43_v19   ;;  %v1569_v18 = vor.u32 %v1912_v11, %v1568_v10  ;;  %v1498_v19 = vld [vmem:[%s2707_s8 + $0x120] sm:$0xff]  ;;  %v1991_v10 = vld [vmem:[%s2705_s6 + $0x8] sm:$0xff] }
  0x3e   :  { %v1955_v11 = vld [vmem:[%s2704_s5 + $0x6c] sm:$0xf]  ;;  %v1748_v13 = vld [vmem:[%s2704_s5 + $0x68] sm:$0xf]  ;;  %1203 = vmatpush.bf16.msra.mxu3 %v1991_v10 }
  0x3f   :  { %1075 = vmatpush.bf16.msrb.mxu0 %v1967_v21  ;;  %1129 = vmatpush.bf16.msra.mxu2 %v1987_v47  ;;  %v1487_v21 = vld [vmem:[%s2707_s8 + $0xc8] sm:$0xff]  ;;  %v1945_v47 = vld [vmem:[%s2704_s5 + $0x14] sm:$0xf0]  ;;  %v1753_v16 = vor.u32 %v1955_v11, %v1750_v12 }
  0x40   :  { %560 = vmatpush.bf16.msrb.mxu1 %v1922_v24  ;;  %v1740_v24 = vld [vmem:[%s2704_s5 + $0x60] sm:$0xf] }
  0x41   :  { %v1741_v26 = vor.u32 %v1956_v25, %v1740_v24 }
  0x42   :  { %1289 = vperm.xlu2 %2008, %v1504_v31   ;;  %v1915_v31 = vld [vmem:[%s2703_s4 + $0x28] sm:$0xf0] }
  0x43   :  { %1076 = vmatpush.bf16.msrb.mxu0 %v1966_v27  ;;  %561 = vmatmul.bf16.vlgmr.msrb.gmra.mxu1 %v1561_v33  ;;  %v1489_v27 = vld [vmem:[%s2707_s8 + $0xd8] sm:$0xff]  ;;  %v1920_v33 = vld [vmem:[%s2703_s4 + $0x50] sm:$0xf0] }
  0x44   :  { %600 = vmatmul.bf16.gmra.mxu2 %v1589_v30  ;;  %1098 = vmatpush.bf16.msra.mxu1 %v1981_v32  ;;  %v1580_v30 = vld [vmem:[%s2703_s4 + $0x20] sm:$0xf]  ;;  %v1596_v32 = vld [vmem:[%s2703_s4 + $0x48] sm:$0xf] }
  0x45   :  { %1284 = vperm.xlu1 %2007, %v1503_v34   ;;  %1279 = vperm.xlu0 %2006, %v1502_v36   ;;  %v1954_v34 = vld [vmem:[%s2704_s5 + $0x64] sm:$0xf]  ;;  %v1581_v36 = vor.u32 %v1915_v31, %v1580_v30  ;;  %v1597_v38 = vor.u32 %v1920_v33, %v1596_v32 }
  0x46   :  { %1077 = vmatmul.bf16.vlgmr.msrb.gmra.mxu0 %v1697_v35  ;;  %1130 = vmatpush.bf16.msra.mxu2 %v1986_v55  ;;  %v1742_v35 = vld [vmem:[%s2704_s5 + $0x70] sm:$0xf0]  ;;  %v1721_v55 = vor.u32 %v1947_v51, %v1718_v52 }
  0x48   :  { %1099 = vmatpush.bf16.msra.mxu1 %v1980_v39  ;;  %v1745_v39 = vor.u32 %v1954_v34, %v1742_v35  ;;  %v1990_v35 = vld [vmem:[%s2705_s6] sm:$0xff] }
  0x49   :  { %1053 = vmatmul.bf16.gmra.mxu3 %v1709_v41  ;;  %v1500_v41 = vld [vmem:[%s2707_s8 + $0x130] sm:$0xff] }
  0x4a   :  { %1304 = vperm.xlu2 %2008, %v1507_v43   ;;  %1131 = vmatpush.bf16.msra.mxu2 %v1985_v2  ;;  %v1491_v43 = vld [vmem:[%s2707_s8 + $0xe8] sm:$0xff] }
  0x4b   :  { %1204 = vmatpush.bf16.msra.mxu3 %v1990_v35 }
  0x4c   :  { %1100 = vmatpush.bf16.msra.mxu1 %v1979_v44  ;;  %v1943_v44 = vld [vmem:[%s2704_s5 + $0xc] sm:$0xf] }
  0x4d   :  { %1299 = vperm.xlu1 %2007, %v1506_v45   ;;  %1294 = vperm.xlu0 %2006, %v1505_v46   ;;  %v1702_v45 = vld [vmem:[%s2704_s5 + $0x18] sm:$0xf0]  ;;  %v1700_v46 = vld [vmem:[%s2704_s5 + $0x8] sm:$0xf] }
  0x4e   :  { %1132 = vmatpush.bf16.msra.mxu2 %v1984_v4  ;;  %v1705_v49 = vor.u32 %v1943_v44, %v1702_v45  ;;  %v1701_v50 = vor.u32 %v1945_v47, %v1700_v46 }
  0x50   :  { %1101 = vmatpush.bf16.msra.mxu1 %v1978_v48  ;;  %v1493_v48 = vld [vmem:[%s2707_s8 + $0xf8] sm:$0xff] }
  0x52   :  { %1327 = vperm.xlu2 %2008, %v1494_v57   ;;  %1133 = vmatpush.bf16.msra.mxu2 %v1983_v9  ;;  %v1951_v57 = vld [vmem:[%s2704_s5 + $0x4c] sm:$0xf] }
  0x53   :  { %566 = vmatmul.bf16.gmra.mxu1 %v1573_v59  ;;  %v1732_v59 = vld [vmem:[%s2704_s5 + $0x48] sm:$0xf] }
  0x54   :  { %605 = vmatmul.bf16.gmra.mxu2 %v1601_v56  ;;  %1102 = vmatpush.bf16.msra.mxu1 %v1977_v58  ;;  %v1717_v56 = vor.u32 %v1949_v54, %v1716_v53  ;;  %v1734_v58 = vld [vmem:[%s2704_s5 + $0x58] sm:$0xf0] }
  0x55   :  { %1314 = vperm.xlu1 %2007, %v1509_v60   ;;  %1309 = vperm.xlu0 %2006, %v1508_v62   ;;  %v1953_v60 = vld [vmem:[%s2704_s5 + $0x54] sm:$0xf0]  ;;  %v1737_v62 = vor.u32 %v1951_v57, %v1734_v58 }
  0x56   :  { %1082 = vmatmul.bf16.gmra.mxu0 %v1713_v61  ;;  %1134 = vmatpush.bf16.msra.mxu2 %v1982_v17 }
  0x58   :  { %1103 = vmatpush.bf16.msra.mxu1 %v1976_v1  ;;  %v1733_v1 = vor.u32 %v1953_v60, %v1732_v59 }
  0x59   :  { %1058 = vmatmul.bf16.gmra.mxu3 %v1725_v3 }
  0x5a   :  { %1342 = vperm.xlu2 %2008, %v1497_v5  }
  0x5c   :  { %1104 = vmatpush.bf16.msra.mxu1 %v1975_v6  ;;  %v138_v61 = vpop.permute.xlu2 %137 }
  0x5d   :  { %1337 = vperm.xlu1 %2007, %v1496_v7   ;;  %1332 = vperm.xlu0 %2006, %v1495_v8  }
  0x60   :  { %1105 = vmatpush.bf16.msra.mxu1 %v1974_v14  ;;  %v1957_v14 = vld [vmem:[%s2704_s5 + $0x74] sm:$0xf0] }
  0x62   :  { %1347 = vperm.xlu2 %2008, %v1498_v19   ;;  %v1749_v19 = vor.u32 %v1957_v14, %v1748_v13 }
  0x63   :  { %571 = vmatmul.bf16.gmra.mxu1 %v1585_v20 }
  0x64   :  { %1686 = vmatmul.msk.bf16.vlgmr.msrb.gmra.mxu2 %vm540_vm0, %v1569_v18 }
  0x65   :  { %1388 = vperm.xlu1 %2007, %v1487_v21   ;;  %1383 = vperm.xlu0 %2006, %v1486_v23  }
  0x66   :  { %1087 = vmatmul.bf16.gmra.mxu0 %v1729_v22  ;;  %v1230_v22 = vld [vmem:[%s2706_s7] sm:$0xf] }
  0x67   :  { %v1246_v23 = vsel %vm1244_vm1, %v1230_v22, 0 }
  0x68   :  { %1255 = vmatpush.bf16.msra.mxu0 %v1246_v23 }
  0x69   :  { %1063 = vmatmul.bf16.gmra.mxu3 %v1741_v26 }
  0x6a   :  { %1398 = vperm.xlu2 %2008, %v1489_v27  }
  0x6d   :  { %1352 = vperm.xlu1 %2007, %v1499_v28   ;;  %1393 = vperm.xlu0 %2006, %v1488_v29  }
  0x72   :  { %1362 = vperm.xlu2 %2008, %v1501_v37  }
  0x73   :  { %576 = vmatmul.bf16.gmra.mxu1 %v1597_v38 }
  0x74   :  { %1687 = vmatmul.msk.bf16.gmra.mxu2 %vm540_vm0, %v1581_v36 }
  0x75   :  { %1403 = vperm.xlu1 %2007, %v1490_v40   ;;  %1357 = vperm.xlu0 %2006, %v1500_v41   ;;  %v118_v63 = vpop.permute.xlu0 %117  ;;  %v128_v17 = vpop.permute.xlu1 %127 }
  0x76   :  { %1092 = vmatmul.bf16.gmra.mxu0 %v1745_v39 }
  0x7a   :  { %1418 = vperm.xlu2 %2008, %v1493_v48  }
  0x7d   :  { %1413 = vperm.xlu1 %2007, %v1492_v42   ;;  %1408 = vperm.xlu0 %2006, %v1491_v43   ;;  %v123_v7 = vpop.permute.xlu0 %122  ;;  %v133_v26 = vpop.permute.xlu1 %132 }
  0x7e   :  { %v323_v43 = vpop.permute.xlu2 %322 }
  0x83   :  { %1106 = vmatmul.bf16.vlgmr.msra.gmra.mxu1 %v1701_v50 }
  0x84   :  { %1135 = vmatmul.bf16.vlgmr.msra.gmra.mxu2 %v1705_v49 }
  0x85   :  { %v328_v47 = vpop.permute.xlu0 %327  ;;  %v731_v52 = vpop.permute.xlu1 %730 }
  0x86   :  { %v736_v51 = vpop.permute.xlu2 %735 }
  0x93   :  { %1111 = vmatmul.bf16.gmra.mxu1 %v1717_v56 }
  0x94   :  { %1140 = vmatmul.bf16.gmra.mxu2 %v1721_v55 }
  0x98   :  { %v2638_v31 = vpop.f32.mrf.mxu3 }
  0xa0   :  { %v246_v0 = vpop.f32.mrf.mxu1  ;;  %v2645_v36 = vpop.f32.mrf.mxu3 }
  0xa1   :  { %v2604_v2 = vadd.f32 %v246_v0, %v138_v61 }
  0xa3   :  { %v236_v3 = vpop.f32.mrf.mxu0  ;;  %1116 = vmatmul.bf16.gmra.mxu1 %v1733_v1  ;;  %v741_v1 = vpop.permute.xlu2 %740 }
  0xa4   :  { %v2606_v4 = vadd.f32 %v236_v3, %v118_v63  ;;  %1145 = vmatmul.bf16.gmra.mxu2 %v1737_v62  ;;  %v333_v63 = vpop.permute.xlu0 %332  ;;  %v338_v3 = vpop.permute.xlu1 %337 }
  0xa6   :  { %v591_v5 = vpop.f32.mrf.mxu2 }
  0xa8   :  { %v2608_v6 = vpop.f32.mrf.mxu1 }
  0xa9   :  { %v2649_v40 = vpop.f32.mrf.mxu3 }
  0xab   :  { %v238_v8 = vpop.f32.mrf.mxu0  ;;  %v348_v23 = vpop.permute.xlu2 %347 }
  0xac   :  { %v2610_v9 = vadd.f32 %v238_v8, %v123_v7 }
  0xae   :  { %v593_v15 = vpop.f32.mrf.mxu2 }
  0xb0   :  { %v2627_v18 = vpop.f32.mrf.mxu1 }
  0xb1   :  { %v2653_v44 = vpop.f32.mrf.mxu3 }
  0xb3   :  { %v241_v20 = vpop.f32.mrf.mxu0  ;;  %1121 = vmatmul.bf16.gmra.mxu1 %v1749_v19 }
  0xb4   :  { %v2629_v21 = vadd.f32 %v241_v20, %v128_v17  ;;  %1150 = vmatmul.bf16.gmra.mxu2 %v1753_v16 }
  0xb7   :  { %v596_v24 = vpop.f32.mrf.mxu2 }
  0xb8   :  { %v2634_v25 = vpop.f32.mrf.mxu1 }
  0xbb   :  { %v243_v27 = vpop.f32.mrf.mxu0 }
  0xbc   :  { %v2636_v28 = vadd.f32 %v243_v27, %v133_v26  ;;  %v1049_v55 = vpop.f32.mrf.mxu3 }
  0xbd   :  { %v1050_v35 = vadd.f32 %v1049_v55, %v731_v52 }
  0xbf   :  { %v598_v29 = vpop.f32.mrf.mxu2 }
  0xc0   :  { %v562_v30 = vpop.f32.mrf.mxu1 }
  0xc1   :  { %v563_v46 = vadd.f32 %v562_v30, %v323_v43 }
  0xc3   :  { %v592_v50 = vadd.f32 %v591_v5, %v563_v46  ;;  %v1078_v61 = vpop.f32.mrf.mxu0 }
  0xc4   :  { %v1051_v7 = vpop.f32.mrf.mxu3 }
  0xc5   :  { %v1052_v43 = vadd.f32 %v1051_v7, %v736_v51 }
  0xc7   :  { %v2640_v32 = vpop.f32.mrf.mxu2 }
  0xc8   :  { %v564_v33 = vpop.f32.mrf.mxu1 }
  0xc9   :  { %v565_v49 = vadd.f32 %v564_v33, %v328_v47  ;;  %v343_v33 = vpop.permute.xlu1 %342  ;;  %v1079_v47 = vadd.f32 %v1078_v61, %v1050_v35 }
  0xcb   :  { %v594_v54 = vadd.f32 %v593_v15, %v565_v49  ;;  %v1080_v12 = vpop.f32.mrf.mxu0  ;;  %v746_v15 = vpop.permute.xlu0 %745 }
  0xcc   :  { %v1054_v26 = vpop.f32.mrf.mxu3 }
  0xcf   :  { %v603_v34 = vpop.f32.mrf.mxu2 }
  0xd0   :  { %v567_v37 = vpop.f32.mrf.mxu1 }
  0xd1   :  { %v568_v5 = vadd.f32 %v567_v37, %v333_v63 }
  0xd3   :  { %v597_v11 = vadd.f32 %v596_v24, %v568_v5  ;;  %v1055_v5 = vadd.f32 %v1054_v26, %v741_v1 }
  0xd7   :  { %v2647_v38 = vpop.f32.mrf.mxu2 }
  0xd8   :  { %v569_v39 = vpop.f32.mrf.mxu1 }
  0xd9   :  { %v570_v10 = vadd.f32 %v569_v39, %v338_v3  ;;  %v1083_v39 = vpop.f32.mrf.mxu0 }
  0xdb   :  { %v599_v14 = vadd.f32 %v598_v29, %v570_v10  ;;  %v751_v29 = vpop.permute.xlu0 %750 }
  0xdf   :  { %v2651_v41 = vpop.f32.mrf.mxu2 }
  0xe0   :  { %v572_v42 = vpop.f32.mrf.mxu1 }
  0xe1   :  { %v573_v37 = vadd.f32 %v572_v42, %v343_v33 }
  0xe3   :  { %v602_v49 = vadd.f32 %v2640_v32, %v573_v37  ;;  %v358_v61 = vpop.permute.xlu0 %357 }
  0xe7   :  { %v620_v45 = vpop.f32.mrf.mxu2 }
  0xe8   :  { %v574_v48 = vpop.f32.mrf.mxu1  ;;  %v621_v53 = vadd.f32 %v620_v45, %v592_v50  ;;  %v1081_v50 = vadd.f32 %v1080_v12, %v1052_v43 }
  0xe9   :  { %v575_v27 = vadd.f32 %v574_v48, %v348_v23  ;;  %v1056_v48 = vpop.f32.mrf.mxu3 }
  0xea   :  { %v640_v59 = vmax.f32 %v621_v53, 0.0 }
  0xeb   :  { %v604_v45 = vadd.f32 %v603_v34, %v575_v27 }
  0xed   :  { %v633_v53 = vadd.f32 %v2645_v36, %v604_v45  ;;  %v353_v36 = vpop.permute.xlu2 %352 }
  0xef   :  { %v622_v56 = vpop.f32.mrf.mxu2 }
  0xf0   :  { %v623_v57 = vadd.f32 %v622_v56, %v594_v54  ;;  %v2655_v58 = vpop.f32.mrf.mxu1  ;;  %v631_v56 = vadd.f32 %v2638_v31, %v602_v49 }
  0xf1   :  { %v578_v7 = vadd.f32 %v2655_v58, %v353_v36  ;;  %v1059_v31 = vpop.f32.mrf.mxu3 }
  0xf2   :  { %v641_v60 = vmax.f32 %v623_v57, 0.0  ;;  %v645_v57 = vmax.f32 %v633_v53, 0.0  ;;  %v644_v34 = vmax.f32 %v631_v56, 0.0 }
  0xf4   :  { %v1164_v62 = vpack.c.bf16 %v641_v60, %v640_v59  ;;  %v1085_v60 = vpop.f32.mrf.mxu0  ;;  %v1166_v3 = vpack.c.bf16 %v645_v57, %v644_v34 }
  0xf5   :  { %v766_v34 = vpop.permute.xlu2 %765 }
  0xf6   :  { %1890 = vmatmul.msk.bf16.vlgmr.msra.gmra.mxu3 %vm1184_vm2, %v1164_v62 }
  0xf7   :  { %v625_v0 = vpop.f32.mrf.mxu2 }
  0xf8   :  { %v579_v8 = vpop.f32.mrf.mxu1  ;;  %v626_v13 = vadd.f32 %v625_v0, %v597_v11  ;;  %v1057_v11 = vadd.f32 %v1056_v48, %v746_v15 }
  0xf9   :  { %v580_v32 = vadd.f32 %v579_v8, %v358_v61 }
  0xfa   :  { %v642_v20 = vmax.f32 %v626_v13, 0.0 }
  0xfb   :  { %v609_v12 = vadd.f32 %v2651_v41, %v580_v32 }
  0xfc   :  { %v1088_v8 = vpop.f32.mrf.mxu0 }
  0xff   :  { %v627_v16 = vpop.f32.mrf.mxu2 }
 0x100   :  { %v628_v17 = vadd.f32 %v627_v16, %v599_v14  ;;  %v1107_v19 = vpop.f32.mrf.mxu1  ;;  %v1084_v14 = vadd.f32 %v1083_v39, %v1055_v5  ;;  %v607_v16 = vadd.f32 %v2647_v38, %v578_v7 }
 0x101   :  { %v1108_v54 = vadd.f32 %v1107_v19, %v1079_v47  ;;  %v638_v19 = vadd.f32 %v2653_v44, %v609_v12  ;;  %v756_v44 = vpop.permute.xlu1 %755 }
 0x102   :  { %v643_v22 = vmax.f32 %v628_v17, 0.0  ;;  %v1086_v17 = vadd.f32 %v1085_v60, %v1057_v11  ;;  %v636_v58 = vadd.f32 %v2649_v40, %v607_v16 }
 0x103   :  { %v647_v26 = vmax.f32 %v638_v19, 0.0 }
 0x104   :  { %v1165_v30 = vpack.c.bf16 %v643_v22, %v642_v20  ;;  %v646_v33 = vmax.f32 %v636_v58, 0.0  ;;  %v1090_v38 = vpop.f32.mrf.mxu0 }
 0x106   :  { %1891 = vmatmul.msk.bf16.gmra.mxu3 %vm1184_vm2, %v1165_v30  ;;  %v1061_v30 = vpop.f32.mrf.mxu3  ;;  %v1167_v39 = vpack.c.bf16 %v647_v26, %v646_v33  ;;  %v256_v33 = vmax.f32 %v2606_v4, 0.0 }
 0x107   :  { %v1136_v24 = vpop.f32.mrf.mxu2  ;;  %v1062_v43 = vadd.f32 %v1061_v30, %v756_v44 }
 0x108   :  { %v1109_v46 = vpop.f32.mrf.mxu1  ;;  %v1137_v52 = vadd.f32 %v1136_v24, %v1108_v54  ;;  %v1060_v24 = vadd.f32 %v1059_v31, %v751_v29 }
 0x109   :  { %v1110_v42 = vadd.f32 %v1109_v46, %v1081_v50  ;;  %v1091_v49 = vadd.f32 %v1090_v38, %v1062_v43 }
 0x10a   :  { %v1156_v62 = vmax.f32 %v1137_v52, 0.0  ;;  %v1089_v46 = vadd.f32 %v1088_v8, %v1060_v24  ;;  %v2675_v8 = vpop.permute.xlu2 %152 }
 0x10c   :  { %v1093_v48 = vpop.f32.mrf.mxu0 }
 0x10e   :  { %v1064_v47 = vpop.f32.mrf.mxu3 }
 0x10f   :  { %v1138_v55 = vpop.f32.mrf.mxu2 }
 0x110   :  { %v1139_v59 = vadd.f32 %v1138_v55, %v1110_v42  ;;  %v1112_v51 = vpop.f32.mrf.mxu1 }
 0x111   :  { %v1113_v1 = vadd.f32 %v1112_v51, %v1084_v14  ;;  %v143_v14 = vpop.permute.xlu0 %142 }
 0x112   :  { %v1157_v63 = vmax.f32 %v1139_v59, 0.0  ;;  %v761_v59 = vpop.permute.xlu1 %760 }
 0x113   :  { %v1065_v51 = vadd.f32 %v1064_v47, %v761_v59 }
 0x114   :  { %v1226_v0 = vpack.c.bf16 %v1157_v63, %v1156_v62  ;;  %v1095_v61 = vpop.f32.mrf.mxu0 }
 0x115   :  { %v1094_v32 = vadd.f32 %v1093_v48, %v1065_v51 }
 0x116   :  { %1892 = vmatmul.msk.bf16.gmra.mxu3 %vm1184_vm2, %v1166_v3  ;;  %1894 = vmatmul.msk.bf16.vlgmr.msra.gmra.mxu0 %vm1231_vm3, %v1226_v0  ;;  %v1066_v60 = vpop.f32.mrf.mxu3 }
 0x117   :  { %v1141_v10 = vpop.f32.mrf.mxu2  ;;  %v1067_v63 = vadd.f32 %v1066_v60, %v766_v34 }
 0x118   :  { %v1114_v13 = vpop.f32.mrf.mxu1  ;;  %v1142_v20 = vadd.f32 %v1141_v10, %v1113_v1  ;;  %v1290_v1 = vpop.permute.xlu2 %1289 }
 0x119   :  { %v1115_v22 = vadd.f32 %v1114_v13, %v1086_v17  ;;  %v1096_v3 = vadd.f32 %v1095_v61, %v1067_v63  ;;  %v1280_v17 = vpop.permute.xlu0 %1279 }
 0x11a   :  { %v1158_v41 = vmax.f32 %v1142_v20, 0.0  ;;  %v2673_v16 = vpop.permute.xlu1 %147  ;;  %v1317_v38 = vmul.f32 %v1280_v17, %v256_v33 }
 0x11f   :  { %v1143_v23 = vpop.f32.mrf.mxu2 }
 0x120   :  { %v1144_v27 = vadd.f32 %v1143_v23, %v1115_v22  ;;  %v1117_v15 = vpop.f32.mrf.mxu1  ;;  %v1305_v23 = vpop.permute.xlu2 %1304 }
 0x121   :  { %v1118_v50 = vadd.f32 %v1117_v15, %v1089_v46  ;;  %v1295_v58 = vpop.permute.xlu0 %1294 }
 0x122   :  { %v1159_v35 = vmax.f32 %v1144_v27, 0.0  ;;  %v1285_v19 = vpop.permute.xlu1 %1284 }
 0x124   :  { %v1227_v37 = vpack.c.bf16 %v1159_v35, %v1158_v41  ;;  %v257_v41 = vmax.f32 %v2610_v9, 0.0 }
 0x126   :  { %1893 = vmatmul.msk.bf16.gmra.mxu3 %vm1184_vm2, %v1167_v39  ;;  %1895 = vmatmul.msk.bf16.gmra.mxu0 %vm1231_vm3, %v1227_v37  ;;  %v1318_v39 = vmul.f32 %v1285_v19, %v257_v41 }
 0x127   :  { %v1146_v40 = vpop.f32.mrf.mxu2 }
 0x128   :  { %v1119_v45 = vpop.f32.mrf.mxu1  ;;  %v1147_v53 = vadd.f32 %v1146_v40, %v1118_v50  ;;  %v1328_v15 = vpop.permute.xlu2 %1327  ;;  %v258_v40 = vmax.f32 %v2629_v21, 0.0 }
 0x129   :  { %v1120_v54 = vadd.f32 %v1119_v45, %v1091_v49  ;;  %v2677_v26 = vpop.permute.xlu0 %1309  ;;  %v1365_v45 = vadd.f32 %v1328_v15, %v1317_v38 }
 0x12a   :  { %v1160_v55 = vmax.f32 %v1147_v53, 0.0  ;;  %v1300_v20 = vpop.permute.xlu1 %1299  ;;  %v1319_v53 = vmul.f32 %v1290_v1, %v258_v40 }
 0x12f   :  { %v1148_v56 = vpop.f32.mrf.mxu2 }
 0x130   :  { %v1149_v52 = vadd.f32 %v1148_v56, %v1120_v54  ;;  %v1122_v42 = vpop.f32.mrf.mxu1  ;;  %v1343_v46 = vpop.permute.xlu2 %1342 }
 0x131   :  { %v1123_v36 = vadd.f32 %v1122_v42, %v1094_v32  ;;  %v1333_v35 = vpop.permute.xlu0 %1332 }
 0x132   :  { %v1161_v29 = vmax.f32 %v1149_v52, 0.0  ;;  %v2679_v27 = vpop.permute.xlu1 %1314  ;;  %v1366_v43 = vadd.f32 %v1333_v35, %v1318_v39  ;;  %v259_v52 = vmax.f32 %v2636_v28, 0.0 }
 0x134   :  { %v1228_v57 = vpack.c.bf16 %v1161_v29, %v1160_v55  ;;  %v1320_v60 = vmul.f32 %v1295_v58, %v259_v52 }
 0x136   :  { %1896 = vmatmul.msk.bf16.gmra.mxu0 %vm1231_vm3, %v1228_v57  ;;  %v1368_v63 = vadd.f32 %v1343_v46, %v1320_v60 }
 0x137   :  { %v1151_v62 = vpop.f32.mrf.mxu2 }
 0x138   :  { %v1124_v0 = vpop.f32.mrf.mxu1  ;;  %v1152_v5 = vadd.f32 %v1151_v62, %v1123_v36  ;;  %v1348_v21 = vpop.permute.xlu2 %1347 }
 0x139   :  { %v1125_v7 = vadd.f32 %v1124_v0, %v1096_v3  ;;  %v1384_v50 = vpop.permute.xlu0 %1383  ;;  %v260_v0 = vmax.f32 %v2604_v2, 0.0 }
 0x13a   :  { %v1162_v11 = vmax.f32 %v1152_v5, 0.0  ;;  %v1338_v37 = vpop.permute.xlu1 %1337 }
 0x13b   :  { %v1367_v42 = vadd.f32 %v1338_v37, %v1319_v53  ;;  %v1321_v5 = vmul.f32 %v1300_v20, %v260_v0  ;;  %v252_v20 = vadd.f32 %v2627_v18, %v2673_v16 }
 0x13f   :  { %v1153_v31 = vpop.f32.mrf.mxu2 }
 0x140   :  { %v1154_v10 = vadd.f32 %v1153_v31, %v1125_v7  ;;  %v1399_v7 = vpop.permute.xlu2 %1398  ;;  %v249_v31 = vadd.f32 %v2608_v6, %v143_v14  ;;  %v262_v14 = vmax.f32 %v252_v20, 0.0 }
 0x141   :  { %v1394_v51 = vpop.permute.xlu0 %1393 }
 0x142   :  { %v1163_v12 = vmax.f32 %v1154_v10, 0.0  ;;  %v1389_v54 = vpop.permute.xlu1 %1388  ;;  %v261_v17 = vmax.f32 %v249_v31, 0.0 }
 0x144   :  { %v1229_v13 = vpack.c.bf16 %v1163_v12, %v1162_v11  ;;  %v1369_v12 = vadd.f32 %v1348_v21, %v1321_v5  ;;  %v1322_v15 = vmul.f32 %v1305_v23, %v261_v17 }
 0x146   :  { %1897 = vmatmul.msk.bf16.gmra.mxu0 %vm1231_vm3, %v1229_v13 }
 0x148   :  { %v1363_v18 = vpop.permute.xlu2 %1362 }
 0x14a   :  { %v1353_v28 = vpop.permute.xlu1 %1352 }
 0x14b   :  { %v1370_v41 = vadd.f32 %v1353_v28, %v1322_v15 }
 0x150   :  { %v1419_v52 = vpop.permute.xlu2 %1418 }
 0x179   :  { %v1206_v22 = vpop.f32.mrf.mxu3 }
 0x17a   :  { %v1373_v47 = vmul.f32 %v1365_v45, %v1206_v22  ;;  %v1358_v22 = vpop.permute.xlu0 %1357 }
 0x17c   :  { %v1421_v48 = vadd.f32 %v1384_v50, %v1373_v47 }
 0x181   :  { %v1208_v30 = vpop.f32.mrf.mxu3 }
 0x182   :  { %v1374_v49 = vmul.f32 %v1366_v43, %v1208_v30  ;;  %v1404_v30 = vpop.permute.xlu1 %1403  ;;  %v1409_v39 = vpop.permute.xlu0 %1408  ;;  %v254_v43 = vadd.f32 %v2634_v25, %v2675_v8 }
 0x184   :  { %v1422_v4 = vadd.f32 %v1389_v54, %v1374_v49  ;;  %v263_v49 = vmax.f32 %v254_v43, 0.0 }
 0x186   :  { %v1324_v50 = vmul.f32 %v2679_v27, %v263_v49  ;;  %v1451_v27 = vstv %s2708_s9 }
 0x189   :  { %v1211_v24 = vpop.f32.mrf.mxu3 }
 0x18a   :  { %v1375_v57 = vmul.f32 %v1367_v42, %v1211_v24  ;;  %v1323_v24 = vmul.f32 %v2677_v26, %v262_v14  ;;  %v1414_v16 = vpop.permute.xlu1 %1413 }
 0x18c   :  { %v1423_v34 = vadd.f32 %v1394_v51, %v1375_v57  ;;  %v1371_v23 = vadd.f32 %v1358_v22, %v1323_v24 }
 0x191   :  { %v1213_v56 = vpop.f32.mrf.mxu3 }
 0x192   :  { %v1376_v3 = vmul.f32 %v1368_v63, %v1213_v56 }
 0x193   :  { %v1257_v44 = vpop.f32.mrf.mxu0 }
 0x194   :  { %v1429_v55 = vmul.f32 %v1421_v48, %v1257_v44  ;;  %v1424_v10 = vadd.f32 %v1399_v7, %v1376_v3 }
 0x199   :  { %v1216_v32 = vpop.f32.mrf.mxu3 }
 0x19a   :  { %v1377_v19 = vmul.f32 %v1369_v12, %v1216_v32 }
 0x19b   :  { %v1259_v9 = vpop.f32.mrf.mxu0 }
 0x19c   :  { %v1430_v29 = vmul.f32 %v1422_v4, %v1259_v9  ;;  %v1425_v33 = vadd.f32 %v1404_v30, %v1377_v19  ;;  %v1372_v4 = vadd.f32 %v1363_v18, %v1324_v50 }
 0x19e   :  { %v1437_v59 = vadd.f32 %v1430_v29, %v1429_v55 }
 0x1a1   :  { %v1218_v58 = vpop.f32.mrf.mxu3 }
 0x1a2   :  { %v1378_v37 = vmul.f32 %v1370_v41, %v1218_v58 }
 0x1a3   :  { %v1262_v62 = vpop.f32.mrf.mxu0 }
 0x1a4   :  { %v1431_v61 = vmul.f32 %v1423_v34, %v1262_v62  ;;  %v1426_v44 = vadd.f32 %v1409_v39, %v1378_v37 }
 0x1a6   :  { %v1438_v36 = vadd.f32 %v1437_v59, %v1431_v61 }
 0x1a9   :  { %v1221_v38 = vpop.f32.mrf.mxu3 }
 0x1aa   :  { %v1379_v46 = vmul.f32 %v1371_v23, %v1221_v38 }
 0x1ab   :  { %v1264_v11 = vpop.f32.mrf.mxu0 }
 0x1ac   :  { %v1432_v13 = vmul.f32 %v1424_v10, %v1264_v11  ;;  %v1427_v53 = vadd.f32 %v1414_v16, %v1379_v46 }
 0x1ae   :  { %v1439_v1 = vadd.f32 %v1438_v36, %v1432_v13 }
 0x1b1   :  { %v1223_v54 = vpop.f32.mrf.mxu3 }
 0x1b2   :  { %v1380_v26 = vmul.f32 %v1372_v4, %v1223_v54 }
 0x1b3   :  { %v1267_v2 = vpop.f32.mrf.mxu0 }
 0x1b4   :  { %v1433_v35 = vmul.f32 %v1425_v33, %v1267_v2  ;;  %v1428_v42 = vadd.f32 %v1419_v52, %v1380_v26 }
 0x1b6   :  { %v1440_v6 = vadd.f32 %v1439_v1, %v1433_v35 }
 0x1bb   :  { %v1269_v40 = vpop.f32.mrf.mxu0 }
 0x1bc   :  { %v1434_v45 = vmul.f32 %v1426_v44, %v1269_v40 }
 0x1be   :  { %v1441_v47 = vadd.f32 %v1440_v6, %v1434_v45 }
 0x1c3   :  { %v1272_v48 = vpop.f32.mrf.mxu0 }
 0x1c4   :  { %v1435_v56 = vmul.f32 %v1427_v53, %v1272_v48 }
 0x1c6   :  { %v1442_v9 = vadd.f32 %v1441_v47, %v1435_v56 }
 0x1cb   :  { %v1274_v55 = vpop.f32.mrf.mxu0 }
 0x1cc   :  { %v1436_v25 = vmul.f32 %v1428_v42, %v1274_v55 }
 0x1ce   :  { %v1443_v8 = vadd.f32 %v1442_v9, %v1436_v25 }
 0x1d0   :  { %v1444_v29 = vrot.slane %v1443_v8, 4 }
 0x1d2   :  { %v1445_v57 = vadd.f32 %v1444_v29, %v1443_v8 }
 0x1d4   :  { %v1446_v59 = vrot.slane %v1445_v57, 2 }
 0x1d6   :  { %v1447_v21 = vadd.f32 %v1446_v59, %v1445_v57 }
 0x1d8   :  { %v1448_v60 = vrot.slane %v1447_v21, 1 }
 0x1da   :  { %v1449_v51 = vadd.f32 %v1448_v60, %v1447_v21 }
 0x1dc   :  { %v1452_v34 = vadd.f32 %v1451_v27, %v1449_v51 }
 0x1de   :  { %1453 = vst [vmem:[#allocation3] sm:$0x1] %v1452_v34 }
 0x1df   :  { %1464 = dma.vmem_to_hbm [thread:$0]  %s1460_s21, 16, %s1462_s23, [#allocation4]  }
 0x1e0   :  { %2033 = dma.done.wait [#allocation4], 16  }
 0x1e1   :  { %2034 = vsyncadd [#allocation4], 4294967280 }
 0x1e2   :  { %1469 = vsyncpa [#allocation4], 1 }

</bundles_post_ra>
